<compile_context>
chip_gen: v6e
topology: v6e:2x2x1
jax: 0.10.0
libtpu: 0.0.40
codegen_flags: <defaults>
</compile_context>

<pallas_src>
import functools

import jax
import jax.numpy as jnp
from jax import lax
from jax.experimental import pallas as pl
from jax.experimental.pallas import tpu as pltpu

_LANES = 128
_TARGET_TILE_BYTES = 4 << 20   # aim for ~2-8 MiB of streamed input per grid step
_SPLIT_BYTES = 2 << 20         # enough work to justify >= 2 grid steps (v7x megacore)
_VMEM_LIMIT_BYTES = 48 << 20   # explicit scoped-VMEM limit (fits v7x's 64 MiB/TC)


def _round_up(x, m):
    return -(-x // m) * m


def _round_down(x, m):
    return (x // m) * m


def _lqloss_packed_kernel(x_ref, side_ref, out_ref, *, q, n_rows):
    """Lane-dense path for C < 128.

    x_ref   : (TB, C, 128) probabilities, native dtype (f32/bf16);
              classes on sublanes, samples on lanes.
    side_ref: (TB, 2, 128) f32; [:, 0, :] = target (small ints), [:, 1, :] =
              per-sample effective weight (alpha folded, 0 for padded samples).
    out_ref : (8, 128) f32 lane-dense block holding this tile's partial sum.
    """
    i = pl.program_id(0)
    tb, c, lanes = x_ref.shape

    x = x_ref[...]                                   # native dtype (no early upcast)
    side = side_ref[...]                             # (TB, 2, 128) f32
    tgt = side[:, 0, :].astype(jnp.int32)            # (TB, 128)
    w = side[:, 1, :]                                # (TB, 128)

    # One-hot select of Yq = input[sample, target[sample]]; exactly one class
    # matches per sample, so the (bf16-safe) sublane reduce is exact.
    cls = lax.broadcasted_iota(jnp.int32, (tb, c, lanes), 1)
    match = cls == tgt[:, None, :]
    zero = jnp.zeros((), dtype=x.dtype)
    yq = jnp.sum(jnp.where(match, x, zero), axis=1).astype(jnp.float32)  # (TB, 128)

    lq = (1.0 - jnp.power(yq, q)) / q                # dense 128-lane EUP work

    # Mask packed rows past the true row count (ragged last grid tile); padded
    # samples inside valid rows are already neutralized by w == 0.
    row = i * tb + lax.broadcasted_iota(jnp.int32, (tb, lanes), 0)
    contrib = jnp.where(row < n_rows, lq * w, 0.0)

    out_ref[...] = jnp.full(out_ref.shape, jnp.sum(contrib), dtype=jnp.float32)


def _lqloss_plain_kernel(x_ref, side_ref, out_ref, *, q, bsz):
    """Plain path for C >= 128 (lane axis already dense)."""
    i = pl.program_id(0)
    tb, c = x_ref.shape

    x = x_ref[...]
    side = side_ref[...]                             # (TB, 2) f32
    tgt = side[:, 0:1].astype(jnp.int32)             # (TB, 1)
    w = side[:, 1:2]                                 # (TB, 1)

    cls = lax.broadcasted_iota(jnp.int32, (tb, c), 1)
    zero = jnp.zeros((), dtype=x.dtype)
    yq = jnp.sum(jnp.where(cls == tgt, x, zero), axis=1,
                 keepdims=True).astype(jnp.float32)  # (TB, 1)

    lq = (1.0 - jnp.power(yq, q)) / q

    row = i * tb + lax.broadcasted_iota(jnp.int32, (tb, 1), 0)
    contrib = jnp.where(row < bsz, lq * w, 0.0)

    out_ref[...] = jnp.full(out_ref.shape, jnp.sum(contrib), dtype=jnp.float32)


def lq_loss(inputs, target, weight, q, alpha=0.0, rows_per_tile=None):
    """inputs: (B, C) probabilities (f32 or bf16); target: (B,) int;
    weight: (C,) f32 class weights (already softmax(log(1/w)), like the module)."""
    B, C = inputs.shape
    target = target.astype(jnp.int32)

    # Fold alpha into one per-sample effective weight outside the kernel:
    #   alpha*lq + (1-alpha)*lq*w[t]  ==  lq * (alpha + (1-alpha)*w[t])
    w_eff = alpha + (1.0 - alpha) * weight.astype(jnp.float32)
    w_per_sample = w_eff[target]                     # (B,) f32
    tgt_f = target.astype(jnp.float32)               # exact for any realistic C
    # TODO(synk): like torch.gather, out-of-range targets are not validated;
    # the in-kernel one-hot yields Yq = 0 while this wrapper gather clamps.

    itemsize = jnp.dtype(inputs.dtype).itemsize

    if C < _LANES:
        # ---------------- lane-dense packed path (small C) ----------------
        nb = _round_up(B, _LANES) // _LANES          # packed rows of 128 samples
        pad = nb * _LANES - B
        xp = jnp.pad(inputs, ((0, pad), (0, 0)))
        # (nb, C, 128): classes -> sublanes, samples -> lanes.  Wrapper-side
        # relayout only (one XLA transpose); all kernel compute is lane-dense.
        xp = xp.reshape(nb, _LANES, C).transpose(0, 2, 1)
        tgt_p = jnp.pad(tgt_f, (0, pad)).reshape(nb, _LANES)
        w_p = jnp.pad(w_per_sample, (0, pad)).reshape(nb, _LANES)  # 0 => pad rows drop out
        side = jnp.stack([tgt_p, w_p], axis=1)       # (nb, 2, 128): single merged side stream

        # Per-packed-row VMEM footprint (x slab sublane-padded to 8) + side slab.
        row_bytes = _round_up(C, 8) * _LANES * itemsize + 8 * _LANES * 4
        tb = max(1, _TARGET_TILE_BYTES // row_bytes)
        if nb >= 2 and nb * row_bytes >= _SPLIT_BYTES:
            tb = min(tb, -(-nb // 2))                # keep >= 2 grid steps for v7x megacore
        tb = int(min(tb, nb))
        if rows_per_tile is not None:
            tb = int(max(1, min(nb, rows_per_tile)))
        num_tiles = -(-nb // tb)

        cost = pl.CostEstimate(
            flops=4 * nb * _LANES * C + 10 * nb * _LANES,
            transcendentals=2 * nb * _LANES,
            bytes_accessed=nb * _LANES * C * itemsize + nb * 2 * _LANES * 4
            + num_tiles * 8 * 128 * 4,
        )
        kernel = functools.partial(_lqloss_packed_kernel, q=float(q), n_rows=int(nb))
        partial_blocks = pl.pallas_call(
            kernel,
            out_shape=jax.ShapeDtypeStruct((num_tiles * 8, 128), jnp.float32),
            grid=(num_tiles,),
            in_specs=[
                pl.BlockSpec((tb, C, _LANES), lambda i: (i, 0, 0)),
                pl.BlockSpec((tb, 2, _LANES), lambda i: (i, 0, 0)),
            ],
            out_specs=pl.BlockSpec((8, 128), lambda i: (i, 0)),
            compiler_params=pltpu.CompilerParams(
                dimension_semantics=("parallel",),
                vmem_limit_bytes=_VMEM_LIMIT_BYTES,
            ),
            cost_estimate=cost,
        )(xp, side)
    else:
        # ---------------- plain path (C >= 128: lanes already dense) ----------------
        side = jnp.stack([tgt_f, w_per_sample], axis=1)   # (B, 2): single side stream

        row_bytes = C * itemsize + 2 * 4
        tb = max(8, _round_down(_TARGET_TILE_BYTES // row_bytes, 8))
        if B >= 16 and B * row_bytes >= _SPLIT_BYTES:
            tb = min(tb, _round_up(-(-B // 2), 8))         # >= 2 grid steps for v7x
        if rows_per_tile is not None:
            tb = max(8, _round_down(int(rows_per_tile), 8))
        if tb >= B:
            tb = B                                          # full-dim block is always legal
        num_tiles = -(-B // tb)

        cost = pl.CostEstimate(
            flops=4 * B * C + 10 * B,
            transcendentals=2 * B,
            bytes_accessed=B * C * itemsize + B * 8 + num_tiles * 8 * 128 * 4,
        )
        kernel = functools.partial(_lqloss_plain_kernel, q=float(q), bsz=int(B))
        partial_blocks = pl.pallas_call(
            kernel,
            out_shape=jax.ShapeDtypeStruct((num_tiles * 8, 128), jnp.float32),
            grid=(num_tiles,),
            in_specs=[
                pl.BlockSpec((tb, C), lambda i: (i, 0)),
                pl.BlockSpec((tb, 2), lambda i: (i, 0)),
            ],
            out_specs=pl.BlockSpec((8, 128), lambda i: (i, 0)),
            compiler_params=pltpu.CompilerParams(
                dimension_semantics=("parallel",),
                vmem_limit_bytes=_VMEM_LIMIT_BYTES,
            ),
            cost_estimate=cost,
        )(inputs, side)

    partials = partial_blocks.reshape(num_tiles, 8, 128)[:, 0, 0]
    return jnp.sum(partials) / jnp.float32(B)


if __name__ == "__main__":
    key = jax.random.PRNGKey(0)
    q = 0.7
    alpha = 0.1

    def make_class_weight(raw):
        # self.weight = softmax(log(1 / weight), dim=-1)
        return jax.nn.softmax(jnp.log(1.0 / raw), axis=-1)

    def reference(probs, target, class_weight):
        probs = probs.astype(jnp.float32)
        yq = jnp.take_along_axis(probs, target[:, None], axis=1)
        lq = (1.0 - jnp.power(yq, q)) / q
        w = class_weight[target][:, None]
        return jnp.mean(alpha * lq + (1.0 - alpha) * lq * w)

    # --- Test 1: packed path, single tile (B=8, C=4, f32: matches the module) ---
    C = 4
    cw = make_class_weight(jnp.array([0.1, 0.2, 0.3, 0.4], dtype=jnp.float32))
    k1, k2, key = jax.random.split(key, 3)
    B = 8
    probs = jax.nn.softmax(jax.random.normal(k1, (B, C), jnp.float32), axis=-1)
    tgt = jax.random.randint(k2, (B,), 0, C, dtype=jnp.int32)
    out = jax.block_until_ready(lq_loss(probs, tgt, cw, q=q, alpha=alpha))
    ref = reference(probs, tgt, cw)
    assert jnp.allclose(out, ref, rtol=1e-5, atol=1e-6), (out, ref)

    # --- Test 2: packed path, multiple packed rows + ragged last grid tile ---
    B2 = 300                        # nb = 3 packed rows; rows_per_tile=2 -> ragged tile
    k3, k4, key = jax.random.split(key, 3)
    probs2 = jax.nn.softmax(jax.random.normal(k3, (B2, C), jnp.float32), axis=-1)
    tgt2 = jax.random.randint(k4, (B2,), 0, C, dtype=jnp.int32)
    out2 = jax.block_until_ready(
        lq_loss(probs2, tgt2, cw, q=q, alpha=alpha, rows_per_tile=2))
    ref2 = reference(probs2, tgt2, cw)
    assert jnp.allclose(out2, ref2, rtol=1e-5, atol=1e-6), (out2, ref2)

    # --- Test 3: bf16 probabilities streamed natively (select stays bf16) ---
    probs2_bf16 = probs2.astype(jnp.bfloat16)
    out3 = jax.block_until_ready(lq_loss(probs2_bf16, tgt2, cw, q=q, alpha=alpha))
    ref3 = reference(probs2_bf16, tgt2, cw)
    assert jnp.allclose(out3, ref3, rtol=1e-4, atol=1e-5), (out3, ref3)

    # --- Test 4: plain path (C >= 128), multi-tile with ragged tail ---
    C4 = 256
    k5, k6, k7, key = jax.random.split(key, 4)
    cw4 = make_class_weight(jax.random.uniform(k5, (C4,), jnp.float32, 0.1, 1.0))
    B4 = 20
    probs4 = jax.nn.softmax(jax.random.normal(k6, (B4, C4), jnp.float32), axis=-1)
    tgt4 = jax.random.randint(k7, (B4,), 0, C4, dtype=jnp.int32)
    out4 = jax.block_until_ready(
        lq_loss(probs4, tgt4, cw4, q=q, alpha=alpha, rows_per_tile=8))
    ref4 = reference(probs4, tgt4, cw4)
    assert jnp.allclose(out4, ref4, rtol=1e-5, atol=1e-6), (out4, ref4)

    print("KERNEL_OK")
</pallas_src>

<mosaic_0001>
module attributes {stable_mosaic.version = 11 : i64} {
  func.func @_lqloss_packed_kernel(%arg0: i32, %arg1: memref<1x4x128xf32, #tpu.memory_space<vmem>>, %arg2: memref<1x2x128xf32, #tpu.memory_space<vmem>>, %arg3: memref<8x128xf32, #tpu.memory_space<vmem>>) attributes {dimension_semantics = [#tpu.dimension_semantics<parallel>], iteration_bounds = array<i64: 1>, scalar_prefetch = 0 : i64, scratch_operands = 0 : i64, tpu.core_type = #tpu.core_type<tc>, window_params = [{transform_indices = @transform_0, window_bounds = array<i64: 1, 4, 128>}, {transform_indices = @transform_1, window_bounds = array<i64: 1, 2, 128>}, {transform_indices = @transform_2, window_bounds = array<i64: 8, 128>}]} {
    %c0 = arith.constant 0 : index
    %c0_0 = arith.constant 0 : index
    %c0_1 = arith.constant 0 : index
    %0 = vector.load %arg1[%c0, %c0_0, %c0_1] : memref<1x4x128xf32, #tpu.memory_space<vmem>>, vector<1x4x128xf32>
    %c0_2 = arith.constant 0 : index
    %c0_3 = arith.constant 0 : index
    %c0_4 = arith.constant 0 : index
    %1 = vector.load %arg2[%c0_2, %c0_3, %c0_4] : memref<1x2x128xf32, #tpu.memory_space<vmem>>, vector<1x2x128xf32>
    %2 = vector.extract_strided_slice %1 {offsets = [0, 0, 0], sizes = [1, 1, 128], strides = [1, 1, 1]} : vector<1x2x128xf32> to vector<1x1x128xf32>
    %3 = vector.shape_cast %2 : vector<1x1x128xf32> to vector<1x128xf32>
    %4 = arith.fptosi %3 : vector<1x128xf32> to vector<1x128xi32>
    %5 = vector.extract_strided_slice %1 {offsets = [0, 1, 0], sizes = [1, 1, 128], strides = [1, 1, 1]} : vector<1x2x128xf32> to vector<1x1x128xf32>
    %6 = vector.shape_cast %5 : vector<1x1x128xf32> to vector<1x128xf32>
    %7 = tpu.iota {dimensions = array<i32: 1>} : vector<1x4x128xi32>
    %8 = vector.shape_cast %4 : vector<1x128xi32> to vector<1x1x128xi32>
    %9 = vector.broadcast %8 : vector<1x1x128xi32> to vector<1x4x128xi32>
    %10 = arith.cmpi eq, %7, %9 : vector<1x4x128xi32>
    %cst = arith.constant 0.000000e+00 : f32
    %11 = vector.broadcast %cst : f32 to vector<1x4x128xf32>
    %12 = arith.select %10, %0, %11 : vector<1x4x128xi1>, vector<1x4x128xf32>
    %cst_5 = arith.constant dense<0.000000e+00> : vector<1x128xf32>
    %13 = vector.multi_reduction <add>, %12, %cst_5 [1] : vector<1x4x128xf32> to vector<1x128xf32>
    %cst_6 = arith.constant 0.699999988 : f32
    %14 = vector.broadcast %cst_6 : f32 to vector<1x128xf32>
    %15 = math.powf %13, %14 : vector<1x128xf32>
    %cst_7 = arith.constant 1.000000e+00 : f32
    %16 = vector.broadcast %cst_7 : f32 to vector<1x128xf32>
    %17 = arith.subf %16, %15 : vector<1x128xf32>
    %cst_8 = arith.constant 0.699999988 : f32
    %18 = vector.broadcast %cst_8 : f32 to vector<1x128xf32>
    %19 = arith.divf %17, %18 : vector<1x128xf32>
    %c1_i32 = arith.constant 1 : i32
    %20 = arith.muli %arg0, %c1_i32 : i32
    %21 = tpu.iota {dimensions = array<i32: 0>} : vector<1x128xi32>
    %22 = vector.broadcast %20 : i32 to vector<1x128xi32>
    %23 = arith.addi %22, %21 : vector<1x128xi32>
    %c1_i32_9 = arith.constant 1 : i32
    %24 = vector.broadcast %c1_i32_9 : i32 to vector<1x128xi32>
    %25 = arith.cmpi slt, %23, %24 : vector<1x128xi32>
    %26 = arith.mulf %19, %6 : vector<1x128xf32>
    %cst_10 = arith.constant 0.000000e+00 : f32
    %27 = vector.broadcast %cst_10 : f32 to vector<1x128xf32>
    %28 = arith.select %25, %26, %27 : vector<1x128xi1>, vector<1x128xf32>
    %29 = vector.shape_cast %28 : vector<1x128xf32> to vector<1x1x128xf32>
    %cst_11 = arith.constant dense<0.000000e+00> : vector<1xf32>
    %30 = vector.multi_reduction <add>, %29, %cst_11 [1, 2] : vector<1x1x128xf32> to vector<1xf32>
    %31 = vector.shape_cast %30 : vector<1xf32> to vector<1x1x1xf32>
    %32 = vector.extract %31[0, 0, 0] : f32 from vector<1x1x1xf32>
    %33 = vector.broadcast %32 : f32 to vector<8x128xf32>
    %c0_12 = arith.constant 0 : index
    %c0_13 = arith.constant 0 : index
    %34 = vector.load %arg3[%c0_12, %c0_13] : memref<8x128xf32, #tpu.memory_space<vmem>>, vector<8x128xf32>
    tpu.vector_store %arg3[%c0_12, %c0_13], %33 {strides = array<i32>} : memref<8x128xf32, #tpu.memory_space<vmem>>, vector<8x128xf32>,
    return
  }
  func.func @transform_0(%arg0: i32) -> (i32, i32, i32) {
    %c0_i32 = arith.constant 0 : i32
    %c0_i32_0 = arith.constant 0 : i32
    %c0_i32_1 = arith.constant 0 : i32
    return %arg0, %c0_i32, %c0_i32_0 : i32, i32, i32
  }
  func.func @transform_1(%arg0: i32) -> (i32, i32, i32) {
    %c0_i32 = arith.constant 0 : i32
    %c0_i32_0 = arith.constant 0 : i32
    %c0_i32_1 = arith.constant 0 : i32
    return %arg0, %c0_i32, %c0_i32_0 : i32, i32, i32
  }
  func.func @transform_2(%arg0: i32) -> (i32, i32) {
    %c0_i32 = arith.constant 0 : i32
    %c0_i32_0 = arith.constant 0 : i32
    return %arg0, %c0_i32 : i32, i32
  }
}

</mosaic_0001>

<bundles_post_ra>
// kernel: tpu_custom_call.1
= control target key start
LH: loop header
LB: loop body
LE: loop exit
PB: predicated region body
PF: predicated region fallthrough
CT: control target
= control target key end

     0   :  { %7 = vsyncpa [#allocation3], 0  ;;  %s226_s0 = inlined_call_operand.hbm [shape: f32[1,4,128], index: 0, kind: input, shape index: {}]   ;;  %s227_s1 = inlined_call_operand.hbm [shape: f32[1,2,128], index: 1, kind: input, shape index: {}]   ;;  %s228_s2 = inlined_call_operand.hbm [shape: f32[8,128], index: 2, kind: output, shape index: {}]  }
   0x1   :  { %8 = vsyncpa [#allocation6], 0 }
   0x2   :  { %9 = vsyncpa [#allocation4], 0  ;;  %s199_s9 = smov [#allocation2]   ;;  %s200_s11 = smov [#allocation5]  }
   0x3   :  { %s16_s10 = sshll.u32 %s199_s9, 4  ;;  %s26_s12 = sshll.u32 %s200_s11, 4  ;;  %s17_s10 = int_to_ptr.vmem [resolvable:$true] %s16_s10  ;;  %s27_s12 = int_to_ptr.vmem [resolvable:$true] %s26_s12 }
   0x4   :  { %s141_s13 = scalar_lea.vmem %s17_s10, 64  ;;  %p146_p1 = scmp.lt.s32.totalorder %s17_s10, %s17_s10 }
   0x5   :  { %p142_p0 = scmp.ne.s32.totalorder %s17_s10, %s141_s13  ;;  %p147_p2 = scmp.lt.s32.totalorder %s141_s13, %s141_s13 }
   0x7   :  { %p148_p3 = por %p147_p2, %p146_p1 }
   0x9   :  { %p149_p4 = pnand %p148_p3, %p142_p0 }
   0xb   :  { %152 = shalt.err (!%p149_p4)
}
   0xc   :  { %19 = dma.hbm_to_vmem [thread:$0]  %s226_s0, 64, %s17_s10, [#allocation3]  }
   0xd   :  { %s161_s16 = scalar_lea.vmem %s27_s12, 32  ;;  %p166_p6 = scmp.lt.s32.totalorder %s27_s12, %s27_s12 }
   0xe   :  { %p162_p5 = scmp.ne.s32.totalorder %s27_s12, %s161_s16  ;;  %p167_p7 = scmp.lt.s32.totalorder %s161_s16, %s161_s16 }
  0x10   :  { %p168_p8 = por %p167_p7, %p166_p6 }
  0x12   :  { %p169_p9 = pnand %p168_p8, %p162_p5 }
  0x14   :  { %172 = shalt.err (!%p169_p9)
}
  0x15   :  { %29 = dma.hbm_to_vmem [thread:$0]  %s227_s1, 32, %s27_s12, [#allocation6]  }
  0x16   :  { %193 = dma.done.wait [#allocation3], 64  }
  0x17   :  { %194 = vsyncadd [#allocation3], 4294967232 }
  0x18   :  { %195 = dma.done.wait [#allocation6], 32  }
  0x19   :  { %196 = vsyncadd [#allocation6], 4294967264  ;;  %v39_v0 = vlaneseq  ;;  %v37_v2 = vld [vmem:[#allocation5] sm:$0x3]  ;;  %v36_v6 = vld [vmem:[#allocation2] sm:$0xf] }
  0x1a   :  { %v96_v3 = vtrunc.f32 %v37_v2  ;;  %vm47_vm0 = vcmask 1043456   ;;  %vm67_vm8 = vcmask 1040384   ;;  %s201_s0 = smov [#allocation7]  }
  0x1b   :  { %v40_v1 = vshrl.u32 %v39_v0, 7  ;;  %s86_s1 = sshll.u32 %s201_s0, 4  ;;  %s87_s1 = int_to_ptr.vmem [resolvable:$true] %s86_s1 }
  0x1c   :  { %v97_v5 = vcvt.f32.s32 %v96_v3  ;;  %s173_s20 = scalar_lea.vmem %s87_s1, 128  ;;  %p178_p11 = scmp.lt.s32.totalorder %s87_s1, %s87_s1 }
  0x1d   :  { %v43_v4 = vsub.s32 0, %v40_v1  ;;  %vm61_vm7 = vcmp.lt.s32.totalorder %v40_v1, 1  ;;  %p174_p10 = scmp.ne.s32.totalorder %s87_s1, %s173_s20  ;;  %p179_p12 = scmp.lt.s32.totalorder %s173_s20, %s173_s20 }
  0x1f   :  { %v44_v7 = vrot.slane %v97_v5, %v43_v4  ;;  %p180_p13 = por %p179_p12, %p178_p11 }
  0x21   :  { %vm45_vm1 = vcmp.eq.s32.totalorder %v40_v1, %v44_v7  ;;  %p181_p0 = pnand %p180_p13, %p174_p10 }
  0x22   :  { %v46_v8 = vsel %vm45_vm1, %v36_v6, 0.0 }
  0x23   :  { %v48_v9 = vsel %vm47_vm0, %v46_v8, 0.0 }
  0x24   :  { %v49_v10 = vrot.slane %v48_v9, 4 }
  0x26   :  { %v50_v11 = vadd.f32 %v49_v10, %v48_v9 }
  0x28   :  { %v51_v12 = vrot.slane %v50_v11, 2 }
  0x2a   :  { %v52_v13 = vadd.f32 %v51_v12, %v50_v11 }
  0x2c   :  { %v53_v14 = vrot.slane %v52_v13, 1 }
  0x2e   :  { %v54_v15 = vadd.f32 %v53_v14, %v52_v13 }
  0x30   :  { %v102_v16 = vand.u32 2147483647, %v54_v15  ;;  %vm106_vm2 = vcmp.lt.f32.partialorder %v54_v15, 0  ;;  %vm107_vm3 = vcmp.eq.f32.partialorder %v54_v15, 0  ;;  %vm119_vm5 = vcmp.ne.f32.partialorder %v54_v15, %v54_v15 }
  0x31   :  { %vm108_vm6 = vcmp.eq.f32.partialorder %v54_v15, 1065353216 }
  0x32   :  { %129 = vlog2.f32 %v102_v16  ;;  %vm111_vm4 = vcmp.eq.f32.partialorder %v102_v16, 2139095040 }
  0x3f   :  { %v130_v17 = vpop.eup %129 }
  0x40   :  { %v104_v18 = vmul.f32 0.7, %v130_v17 }
  0x42   :  { %131 = vpow2.f32 %v104_v18 }
  0x4f   :  { %v132_v19 = vpop.eup %131 }
  0x50   :  { %v112_v20 = vsel %vm106_vm2, 2143289344, %v132_v19 }
  0x51   :  { %v113_v21 = vsel %vm107_vm3, 0, %v112_v20 }
  0x52   :  { %v118_v22 = vsel %vm111_vm4, 2139095040, %v113_v21 }
  0x53   :  { %v122_v23 = vsel %vm119_vm5, 2143289344, %v118_v22 }
  0x54   :  { %v123_v24 = vsel %vm108_vm6, 1065353216, %v122_v23 }
  0x55   :  { %v56_v25 = vsub.f32 1.0, %v123_v24 }
  0x57   :  { %v58_v26 = vmul.f32 1.4285715, %v56_v25 }
  0x59   :  { %v62_v27 = vmul.f32 %v58_v26, %v37_v2 }
  0x5b   :  { %v64_v28 = vrot.slane %v62_v27, 1 }
  0x5d   :  { %v66_v29 = vsel %vm61_vm7, %v64_v28, 0.0 }
  0x5e   :  { %v68_v30 = vsel %vm67_vm8, %v66_v29, 0.0 }
  0x5f   :  { %69 = vadd.xlane.f32.xlu0 %v68_v30 }
  0xe8   :  { %v70_v31 = vpop.xlane.xlu0 %69 }
  0xe9   :  { %v71_v32 = vrot.slane %v70_v31, 4 }
  0xeb   :  { %v72_v33 = vadd.f32 %v71_v32, %v70_v31 }
  0xed   :  { %v73_v34 = vrot.slane %v72_v33, 2 }
  0xef   :  { %v74_v35 = vadd.f32 %v73_v34, %v72_v33 }
  0xf1   :  { %v75_v36 = vrot.slane %v74_v35, 1 }
  0xf3   :  { %v76_v37 = vadd.f32 %v75_v36, %v74_v35 }
  0xf5   :  { %124 = vpush %v76_v37 }
 0x126   :  { %s125_s19 = spop %124 }
 0x127   :  { %v78_v38 = vstv %s125_s19 }
 0x128   :  { %79 = vst [vmem:[#allocation7] sm:$0xff] %v78_v38 }
 0x129   :  { %184 = shalt.err (!%p181_p0)
}
 0x12a   :  { %89 = dma.vmem_to_hbm [thread:$0]  %s87_s1, 128, %s228_s2, [#allocation4]  }
 0x12b   :  { %197 = dma.done.wait [#allocation4], 128  }
 0x12c   :  { %198 = vsyncadd [#allocation4], 4294967168 }
 0x12d   :  { %93 = vsyncpa [#allocation3], 1 }
 0x12e   :  { %94 = vsyncpa [#allocation6], 1 }
 0x12f   :  { %95 = vsyncpa [#allocation4], 1 }

</bundles_post_ra>
